<compile_context>
chip_gen: v7x
topology: tpu7x:2x2x1
jax: 0.10.0
libtpu: 0.0.40
codegen_flags: <defaults>
</compile_context>

<pallas_src>
import functools

import jax
import jax.numpy as jnp
from jax import lax
from jax.experimental import pallas as pl
from jax.experimental.pallas import tpu as pltpu

_LANES = 128
_SUBLANES = 8
_NCORES = 2                # leading "parallel" grid axis (megacore on v7x)
_FALLBACK_ELEMS = 16384    # below ~one (128,128) tile use one fused XLA reduce


def _cdiv(a, b):
    return -(-a // b)


def _round_up(x, m):
    return _cdiv(x, m) * m


def _row_tile_cap():
    """Largest row tile (rows of 128 lanes) per TPU generation.

    8192 rows = 4 MiB per f32 input tile; pred+tgt double-buffered = 16 MiB
    (+2 MiB int8 mask) fits the 32 MiB scoped-VMEM default on v6e/v7x.
    v5e's scoped default is 16 MiB, so cap at 4096 rows (~9-10 MiB) there and
    on unknown chips -- no vmem_limit_bytes bump required anywhere.
    """
    try:
        kind = jax.devices()[0].device_kind.lower()
    except Exception:
        kind = ""
    if "v6" in kind or "v7" in kind:
        return 8192
    return 4096


def _smooth_l1(pred, tgt):
    # PyTorch smooth_l1_loss, beta=1 (summed by the caller).
    diff = pred.astype(jnp.float32) - tgt.astype(jnp.float32)
    absd = jnp.abs(diff)
    return jnp.where(absd < 1.0, 0.5 * diff * diff, absd - 0.5)


def _fold_rows(x):
    """(tr, 128) -> (1, 8, 128) partial sums using only leading-axis VALU adds."""
    tr = x.shape[0]
    return jnp.sum(x.reshape(tr // _SUBLANES, _SUBLANES, _LANES),
                   axis=0).reshape(1, _SUBLANES, _LANES)


def _lane_dense(x, pad, rows):
    flat = x.reshape(-1)                        # contiguous reshape: free bitcast
    if pad:
        # TODO(synk): only hit when total % 128 != 0; this materializes one
        # padded copy (aligned shapes, the common case, stay zero-copy).
        flat = jnp.pad(flat, (0, pad))          # zeros self-mask in both kernels
    return flat.reshape(rows, _LANES)


def _kernel_nomask(pred_ref, tgt_ref, loss_ref, num_ref, *,
                   bpc, n_blk, ragged_rows):
    c = pl.program_id(0)
    i = pl.program_id(1)
    blk = c * bpc + i
    tr = pred_ref.shape[0]

    @pl.when(i == 0)
    def _init():
        loss_ref[...] = jnp.zeros_like(loss_ref)
        num_ref[...] = jnp.zeros_like(num_ref)

    def accumulate(row_valid):
        t = tgt_ref[...].astype(jnp.float32)
        sl1 = _smooth_l1(pred_ref[...], t)
        m = t != 0.0                             # per-element mask (mask is None)
        if row_valid is not None:
            m = jnp.logical_and(m, row_valid)
        loss_ref[...] += _fold_rows(jnp.where(m, sl1, 0.0))
        num_ref[...] += _fold_rows(jnp.where(m, 1.0, 0.0))

    n_full = n_blk - 1 if ragged_rows else n_blk

    @pl.when(blk < n_full)                       # fast path: no row masking
    def _full():
        accumulate(None)

    if ragged_rows:                              # only the single ragged block
        @pl.when(blk == n_blk - 1)
        def _ragged():
            row = lax.broadcasted_iota(jnp.int32, (tr, _LANES), 0)
            accumulate(row < ragged_rows)
    # blocks with blk >= n_blk (clamped duplicates from in_map) are skipped.


def _kernel_mask(pred_ref, tgt_ref, mask_ref, loss_ref, *,
                 bpc, n_blk, ragged_rows):
    c = pl.program_id(0)
    i = pl.program_id(1)
    blk = c * bpc + i
    tr = pred_ref.shape[0]

    @pl.when(i == 0)
    def _init():
        loss_ref[...] = jnp.zeros_like(loss_ref)

    def accumulate(row_valid):
        sl1 = _smooth_l1(pred_ref[...], tgt_ref[...])
        m = mask_ref[...] != 0                   # int8 {0,1} -> select, no mul
        if row_valid is not None:
            m = jnp.logical_and(m, row_valid)
        loss_ref[...] += _fold_rows(jnp.where(m, sl1, 0.0))

    n_full = n_blk - 1 if ragged_rows else n_blk

    @pl.when(blk < n_full)
    def _full():
        accumulate(None)

    if ragged_rows:
        @pl.when(blk == n_blk - 1)
        def _ragged():
            row = lax.broadcasted_iota(jnp.int32, (tr, _LANES), 0)
            accumulate(row < ragged_rows)


def reg_loss(pred, mask, target):
    """pred/target: (B, M, D) floats; mask: (B, M), (B, M, D) bool-like, or None."""
    B, M, D = pred.shape
    total = B * M * D

    num = None
    mask_e = None
    if mask is not None:
        mask_b = mask != 0
        num = jnp.sum(mask_b.astype(jnp.float32))   # PyTorch counts the ORIGINAL mask
        mask_e = mask_b if mask_b.ndim == 3 else \
            jnp.broadcast_to(mask_b[:, :, None], (B, M, D))

    if total < _FALLBACK_ELEMS:
        # Launch + wrapper overhead dominates at this size: one fused XLA
        # reduction beats a Pallas call plus auxiliary kernels.
        if mask is None:
            m = target != 0
            num = jnp.sum(m.astype(jnp.float32))
        else:
            m = mask_e
        sl1 = _smooth_l1(pred, target)
        return jnp.sum(jnp.where(m, sl1, 0.0)) / (num + 0.0001)

    padded = _round_up(total, _LANES)
    pad = padded - total
    R = padded // _LANES                         # number of 128-lane rows
    # Split rows so both "cores" get work; cap by generation-safe VMEM tile.
    tr = min(_row_tile_cap(), _round_up(_cdiv(R, _NCORES), 32))
    n_blk = _cdiv(R, tr)
    bpc = _cdiv(n_blk, _NCORES)                  # row-blocks per core
    ragged_rows = R % tr                         # 0 => no ragged final block

    pred2d = _lane_dense(pred, pad, R)
    tgt2d = _lane_dense(target, pad, R)

    def in_map(c, i):
        # Clamp: an out-of-range block on the tail core re-reads a valid block;
        # its accumulation is skipped in-kernel with pl.when.
        return (jnp.minimum(c * bpc + i, n_blk - 1), 0)

    data_spec = pl.BlockSpec((tr, _LANES), in_map)
    out_spec = pl.BlockSpec((1, _SUBLANES, _LANES), lambda c, i: (c, 0, 0))
    part_shape = jax.ShapeDtypeStruct((_NCORES, _SUBLANES, _LANES), jnp.float32)
    # First axis "parallel": on v7x each TensorCore reduces one half of the
    # blocks; on 1-TC chips both c values run sequentially (same total work).
    cparams = pltpu.CompilerParams(
        dimension_semantics=("parallel", "arbitrary"))

    if mask is None:
        kernel = functools.partial(_kernel_nomask, bpc=bpc, n_blk=n_blk,
                                   ragged_rows=ragged_rows)
        loss_part, num_part = pl.pallas_call(
            kernel,
            out_shape=(part_shape, part_shape),
            grid_spec=pltpu.PrefetchScalarGridSpec(
                num_scalar_prefetch=0,
                grid=(_NCORES, bpc),
                in_specs=[data_spec, data_spec],
                out_specs=[out_spec, out_spec]),
            compiler_params=cparams,
        )(pred2d, tgt2d)
        loss_sum = jnp.sum(loss_part)
        num = jnp.sum(num_part)
    else:
        # TODO(synk): int8 element mask (1 B/elem HBM stream); bit-packing it
        # 8x smaller was suggested but is not implemented here.
        mask2d = _lane_dense(mask_e.astype(jnp.int8), pad, R)
        kernel = functools.partial(_kernel_mask, bpc=bpc, n_blk=n_blk,
                                   ragged_rows=ragged_rows)
        loss_part = pl.pallas_call(
            kernel,
            out_shape=part_shape,
            grid_spec=pltpu.PrefetchScalarGridSpec(
                num_scalar_prefetch=0,
                grid=(_NCORES, bpc),
                in_specs=[data_spec, data_spec, data_spec],
                out_specs=out_spec),
            compiler_params=cparams,
        )(pred2d, tgt2d, mask2d)
        loss_sum = jnp.sum(loss_part)

    return loss_sum / (num + 0.0001)


def _ref_reg_loss(pred, mask, target):
    """Pure-JAX mirror of the PyTorch _reg_loss (verification only)."""
    if mask is None:
        m = (target != 0).astype(jnp.float32)
        num = m.sum()
    else:
        mf = (mask != 0).astype(jnp.float32)
        num = mf.sum()
        m = mf if mf.ndim == 3 else mf[:, :, None]
    diff = pred.astype(jnp.float32) - target.astype(jnp.float32)
    absd = jnp.abs(diff)
    sl1 = jnp.where(absd < 1.0, 0.5 * diff * diff, absd - 0.5)
    return (sl1 * m).sum() / (num + 0.0001)


if __name__ == "__main__":
    key = jax.random.PRNGKey(0)
    ks = jax.random.split(key, 16)

    def check(pred, mask, target, rtol):
        got = reg_loss(pred, mask, target)
        jax.block_until_ready(got)
        want = _ref_reg_loss(pred, mask, target)
        assert jnp.allclose(got, want, rtol=rtol, atol=1e-6), (got, want)

    # 1) Canonical small CenterFace shape (small-input fused-XLA fallback path).
    p = jax.random.normal(ks[0], (2, 8, 4), jnp.float32)
    t = 2.0 * jax.random.normal(ks[1], (2, 8, 4), jnp.float32)
    m = jax.random.uniform(ks[2], (2, 8)) > 0.5
    check(p, m, t, 1e-5)
    check(p, None, t, 1e-5)

    # 2) Aligned total, one full block per core, 3-D element mask.
    p = jax.random.normal(ks[3], (2, 256, 64), jnp.float32)
    t = 2.0 * jax.random.normal(ks[4], (2, 256, 64), jnp.float32)
    m3 = jax.random.uniform(ks[5], (2, 256, 64)) > 0.5
    check(p, m3, t, 1e-4)
    check(p, None, t, 1e-4)

    # 3) Larger aligned total (zero-copy repack), 2-D object mask.
    p = jax.random.normal(ks[6], (4, 1024, 160), jnp.float32)
    t = 2.0 * jax.random.normal(ks[7], (4, 1024, 160), jnp.float32)
    m = jax.random.uniform(ks[8], (4, 1024)) > 0.5
    check(p, m, t, 1e-4)
    check(p, None, t, 1e-4)

    # 4) Total not divisible by 128: padded repack + ragged final block.
    p = jax.random.normal(ks[9], (3, 310, 33), jnp.float32)
    t = 2.0 * jax.random.normal(ks[10], (3, 310, 33), jnp.float32)
    m = jax.random.uniform(ks[11], (3, 310)) > 0.5
    check(p, m, t, 1e-4)
    check(p, None, t, 1e-4)

    # 5) Multi-step accumulation per core (bpc > 1) plus a clamped/skipped block.
    p = jax.random.normal(ks[12], (4, 4096, 160), jnp.float32)
    t = 2.0 * jax.random.normal(ks[13], (4, 4096, 160), jnp.float32)
    m = jax.random.uniform(ks[14], (4, 4096)) > 0.5
    check(p, m, t, 1e-4)
    check(p, None, t, 1e-4)

    print("KERNEL_OK")
</pallas_src>

<mosaic_0001>
module attributes {stable_mosaic.version = 11 : i64} {
  func.func @_kernel_mask(%arg0: i32, %arg1: i32, %arg2: memref<128x128xf32, #tpu.memory_space<vmem>>, %arg3: memref<128x128xf32, #tpu.memory_space<vmem>>, %arg4: memref<128x128xi8, #tpu.memory_space<vmem>>, %arg5: memref<1x8x128xf32, #tpu.memory_space<vmem>>) attributes {dimension_semantics = [#tpu.dimension_semantics<parallel>, #tpu.dimension_semantics<arbitrary>], iteration_bounds = array<i64: 2, 1>, scalar_prefetch = 0 : i64, scratch_operands = 0 : i64, tpu.core_type = #tpu.core_type<tc>, window_params = [{transform_indices = @transform_0, window_bounds = array<i64: 128, 128>}, {transform_indices = @transform_1, window_bounds = array<i64: 128, 128>}, {transform_indices = @transform_2, window_bounds = array<i64: 128, 128>}, {transform_indices = @transform_3, window_bounds = array<i64: 1, 8, 128>}]} {
    %c1_i32 = arith.constant 1 : i32
    %0 = arith.muli %arg0, %c1_i32 : i32
    %1 = arith.addi %0, %arg1 : i32
    %c0_i32 = arith.constant 0 : i32
    %2 = arith.cmpi eq, %arg1, %c0_i32 : i32
    %3 = arith.extui %2 : i1 to i32
    %c0_i32_0 = arith.constant 0 : i32
    %4 = arith.cmpi ne, %3, %c0_i32_0 : i32
    scf.if %4 {
      %cst = arith.constant 0.000000e+00 : f32
      %8 = vector.broadcast %cst : f32 to vector<1x8x128xf32>
      %c0 = arith.constant 0 : index
      %c0_2 = arith.constant 0 : index
      %c0_3 = arith.constant 0 : index
      %9 = vector.load %arg5[%c0, %c0_2, %c0_3] : memref<1x8x128xf32, #tpu.memory_space<vmem>>, vector<1x8x128xf32>
      tpu.vector_store %arg5[%c0, %c0_2, %c0_3], %8 {strides = array<i32>} : memref<1x8x128xf32, #tpu.memory_space<vmem>>, vector<1x8x128xf32>,
    } else {
    }
    %c2_i32 = arith.constant 2 : i32
    %5 = arith.cmpi slt, %1, %c2_i32 : i32
    %6 = arith.extui %5 : i1 to i32
    %c0_i32_1 = arith.constant 0 : i32
    %7 = arith.cmpi ne, %6, %c0_i32_1 : i32
    scf.if %7 {
      %c0 = arith.constant 0 : index
      %c0_2 = arith.constant 0 : index
      %8 = vector.load %arg2[%c0, %c0_2] : memref<128x128xf32, #tpu.memory_space<vmem>>, vector<128x128xf32>
      %c0_3 = arith.constant 0 : index
      %c0_4 = arith.constant 0 : index
      %9 = vector.load %arg3[%c0_3, %c0_4] : memref<128x128xf32, #tpu.memory_space<vmem>>, vector<128x128xf32>
      %10 = arith.subf %8, %9 : vector<128x128xf32>
      %11 = math.absf %10 : vector<128x128xf32>
      %cst = arith.constant 1.000000e+00 : f32
      %12 = vector.broadcast %cst : f32 to vector<128x128xf32>
      %13 = arith.cmpf olt, %11, %12 : vector<128x128xf32>
      %cst_5 = arith.constant 5.000000e-01 : f32
      %14 = vector.broadcast %cst_5 : f32 to vector<128x128xf32>
      %15 = arith.mulf %14, %10 : vector<128x128xf32>
      %16 = arith.mulf %15, %10 : vector<128x128xf32>
      %cst_6 = arith.constant 5.000000e-01 : f32
      %17 = vector.broadcast %cst_6 : f32 to vector<128x128xf32>
      %18 = arith.subf %11, %17 : vector<128x128xf32>
      %19 = arith.select %13, %16, %18 : vector<128x128xi1>, vector<128x128xf32>
      %c0_7 = arith.constant 0 : index
      %c0_8 = arith.constant 0 : index
      %20 = vector.load %arg4[%c0_7, %c0_8] : memref<128x128xi8, #tpu.memory_space<vmem>>, vector<128x128xi8>
      %c0_i8 = arith.constant 0 : i8
      %21 = vector.broadcast %c0_i8 : i8 to vector<128x128xi8>
      %22 = arith.cmpi ne, %20, %21 : vector<128x128xi8>
      %c0_9 = arith.constant 0 : index
      %c0_10 = arith.constant 0 : index
      %c0_11 = arith.constant 0 : index
      %23 = vector.load %arg5[%c0_9, %c0_10, %c0_11] : memref<1x8x128xf32, #tpu.memory_space<vmem>>, vector<1x8x128xf32>
      %cst_12 = arith.constant 0.000000e+00 : f32
      %24 = vector.broadcast %cst_12 : f32 to vector<128x128xf32>
      %25 = arith.select %22, %19, %24 : vector<128x128xi1>, vector<128x128xf32>
      %26 = vector.shape_cast %25 : vector<128x128xf32> to vector<16x8x128xf32>
      %cst_13 = arith.constant dense<0.000000e+00> : vector<8x128xf32>
      %27 = vector.multi_reduction <add>, %26, %cst_13 [0] : vector<16x8x128xf32> to vector<8x128xf32>
      %28 = vector.shape_cast %27 : vector<8x128xf32> to vector<1x8x128xf32>
      %29 = arith.addf %23, %28 : vector<1x8x128xf32>
      %c0_14 = arith.constant 0 : index
      %c0_15 = arith.constant 0 : index
      %c0_16 = arith.constant 0 : index
      %30 = vector.load %arg5[%c0_14, %c0_15, %c0_16] : memref<1x8x128xf32, #tpu.memory_space<vmem>>, vector<1x8x128xf32>
      tpu.vector_store %arg5[%c0_14, %c0_15, %c0_16], %29 {strides = array<i32>} : memref<1x8x128xf32, #tpu.memory_space<vmem>>, vector<1x8x128xf32>,
    } else {
    }
    return
  }
  func.func @transform_0(%arg0: i32, %arg1: i32) -> (i32, i32) {
    %c1_i32 = arith.constant 1 : i32
    %0 = arith.muli %arg0, %c1_i32 : i32
    %1 = arith.addi %0, %arg1 : i32
    %c1_i32_0 = arith.constant 1 : i32
    %2 = arith.minsi %1, %c1_i32_0 : i32
    %c0_i32 = arith.constant 0 : i32
    %c0_i32_1 = arith.constant 0 : i32
    return %2, %c0_i32 : i32, i32
  }
  func.func @transform_1(%arg0: i32, %arg1: i32) -> (i32, i32) {
    %c1_i32 = arith.constant 1 : i32
    %0 = arith.muli %arg0, %c1_i32 : i32
    %1 = arith.addi %0, %arg1 : i32
    %c1_i32_0 = arith.constant 1 : i32
    %2 = arith.minsi %1, %c1_i32_0 : i32
    %c0_i32 = arith.constant 0 : i32
    %c0_i32_1 = arith.constant 0 : i32
    return %2, %c0_i32 : i32, i32
  }
  func.func @transform_2(%arg0: i32, %arg1: i32) -> (i32, i32) {
    %c1_i32 = arith.constant 1 : i32
    %0 = arith.muli %arg0, %c1_i32 : i32
    %1 = arith.addi %0, %arg1 : i32
    %c1_i32_0 = arith.constant 1 : i32
    %2 = arith.minsi %1, %c1_i32_0 : i32
    %c0_i32 = arith.constant 0 : i32
    %c0_i32_1 = arith.constant 0 : i32
    return %2, %c0_i32 : i32, i32
  }
  func.func @transform_3(%arg0: i32, %arg1: i32) -> (i32, i32, i32) {
    %c0_i32 = arith.constant 0 : i32
    %c0_i32_0 = arith.constant 0 : i32
    %c0_i32_1 = arith.constant 0 : i32
    return %arg0, %c0_i32, %c0_i32_0 : i32, i32, i32
  }
}

</mosaic_0001>

<bundles_post_ra>
// kernel: tpu_custom_call.1
= control target key start
LH: loop header
LB: loop body
LE: loop exit
PB: predicated region body
PF: predicated region fallthrough
CT: control target
= control target key end

     0   :  { %s1871_s0 = inlined_call_operand.hbm [shape: f32[256,128], index: 0, kind: input, shape index: {}]   ;;  %s1872_s1 = inlined_call_operand.hbm [shape: f32[256,128], index: 1, kind: input, shape index: {}]   ;;  %s1873_s2 = inlined_call_operand.hbm [shape: s8[256,128], index: 2, kind: input, shape index: {}]   ;;  %s1874_s3 = inlined_call_operand.hbm [shape: f32[2,8,128], index: 3, kind: output, shape index: {}]  }
   0x1   :  { %1887 = sst [smem:[#allocation17_spill]] %s1871_s0 }
   0x2   :  { %1888 = sst [smem:[#allocation18_spill]] %s1872_s1 }
   0x3   :  { %8 = vsyncpa [#allocation3], 0 }
   0x4   :  { %10 = vsyncpa [#allocation3 + $0x1], 0 }
   0x5   :  { %11 = vsyncpa [#allocation6], 0 }
   0x6   :  { %13 = vsyncpa [#allocation6 + $0x1], 0 }
   0x7   :  { %14 = vsyncpa [#allocation4], 0 }
   0x8   :  { %16 = vsyncpa [#allocation4 + $0x1], 0  ;;  %s1138_s12 = smov 0   ;;  %s1140_s13 = smov 0  }
   0x9   :  { %s1142_s14 = smov 0   ;;  %s1144_s15 = smov 0  }
   0xa   :  { %s1146_s16 = smov 0   ;;  %s1148_s17 = smov 0  }
   0xb   :  { %s1150_s18 = smov 0   ;;  %s1152_s19 = smov 0  }
   0xc   :  { %s1154_s20 = smov 0  }
   0xd LB: > { %1889 = sst [smem:[#allocation12_spill]] %s1096_s17  ;;  %s1182_s21 = sadd.s32 4294967295, %s1108_s20   ;;  %s1108_s20 = sphi %s1154_s20, %s22_s20   ;;  %s1104_s19 = sphi %s1152_s19, %s1965_s19   ;;  %s1100_s18 = sphi %s1150_s18, %s1964_s18   ;;  %s1096_s17 = sphi %s1148_s17, %s1963_s17   ;;  %s1092_s16 = sphi %s1146_s16, %s1970_s16   ;;  %s1088_s15 = sphi %s1144_s15, %s1969_s15   ;;  %s1084_s14 = sphi %s1142_s14, %s1968_s14   ;;  %s1080_s13 = sphi %s1140_s13, %s1967_s13   ;;  %s1076_s12 = sphi %s1138_s12, %s1966_s12  }
   0xe   : > { %1890 = sst [smem:[#allocation13_spill]] %s1104_s19  ;;  %s767_s22 = sadd.s32 4294967294, %s1108_s20  }
   0xf   : > { %s34_s23 = sadd.s32 1, %s1104_s19  ;;  %p39_p0 = scmp.lt.s32.totalorder %s1104_s19, 1 }
  0x10   : > { %p36_p1 = scmp.ge.s32.totalorder %s34_s23, 2  ;;  %s47_s24 = sadd.s32 1, %s1096_s17 }
  0x11   : > { %s1189_s25 = scalar_select %p39_p0, %s1104_s19, 1 }
  0x12   : > { %s1972_s23 = smov (%p36_p1, %s34_s23), 0  ;;  %p54_p2 = scmp.ne.s32.totalorder %s1096_s17, %s1092_s16 }
  0x13   : > { %1891 = sst [smem:[#allocation14_spill]] %s1972_s23  ;;  %p55_p3 = scmp.eq.s32.totalorder %s1108_s20, 0 }
  0x14   : > { %p42_p4 = scmp.lt.s32.totalorder %s1972_s23, 1  ;;  %p60_p5 = scmp.ne.s32.totalorder %s1092_s16, %s1088_s15 }
  0x15   : > { %p1198_p6 = por %p55_p3, %p54_p2  ;;  %p61_p7 = scmp.eq.s32.totalorder %s1182_s21, 0 }
  0x16   : > { %s43_s27 = scalar_select %p42_p4, %s1972_s23, 1 }
  0x17   : > { %p1204_p8 = por %p61_p7, %p60_p5  ;;  %s134_s29 = ssub.s32 %s1104_s19, %s1972_s23 }
  0x18   : > { %s44_s30 = ssub.s32 %s1189_s25, %s43_s27  ;;  %p135_p9 = scmp.eq.s32.totalorder %s134_s29, 0 }
  0x19   : > { %s1893_s28 = scalar_select %p1204_p8, 1, 0 }
  0x1a   : > { %p45_p10 = scmp.eq.s32.totalorder %s44_s30, 0  ;;  %s137_s4 = sadd.s32 1, %s1084_s14 }
  0x1b   : > { %s1213_s5 = scalar_select %p135_p9, %s1084_s14, %s137_s4  }
  0x1c   : > { %s1216_s6 = scalar_select %p45_p10, %s1096_s17, %s47_s24  }
  0x1d   : > { %1894 = sst [smem:[#allocation15_spill]] %s1213_s5  ;;  %p147_p11 = scmp.ne.s32.totalorder %s1084_s14, %s1080_s13 }
  0x1e   : > { %1895 = sst [smem:[#allocation16_spill]] %s1216_s6  ;;  %p148_p12 = scmp.eq.s32.totalorder %s1182_s21, 1 }
  0x1f   : > { %p153_p13 = scmp.ne.s32.totalorder %s1080_s13, %s1076_s12  ;;  %p154_p0 = scmp.eq.s32.totalorder %s767_s22, 1 }
  0x20   : > { %p1223_p1 = por %p148_p12, %p147_p11  ;;  %p830_p4 = scmp.lt.s32.totalorder %s1108_s20, 2 }
  0x21   : > { %p1228_p3 = por %p154_p0, %p153_p13  ;;  %s1234_s9 = sand.u32 1, %s1096_s17  }
  0x22   : > { %s1896_s7 = scalar_select %p1223_p1, 1, 0 }
  0x23   : > { %s1897_s8 = scalar_select %p1228_p3, 1, 0 }
  0x24   : > { %s1878_s10 = sshll.u32 %s1189_s25, 11  ;;  %s1877_s11 = sshll.u32 %s1234_s9, 7 }
  0x25   : > { %p1240_p5 = pnand %p830_p4, %p1198_p6  ;;  %s198_s22 = sand.u32 1, %s1108_s20  }
  0x26   : > { %s1899_s1 = sld [smem:[#allocation18_spill]]  ;;  %s202_s30 = scalar_lea.vmem [#allocation5], %s1877_s11 }
  0x27   : > { %s212_s4 = sshll.u32 %s202_s30, 4  ;;  %s1257_s26 = scalar_lea.sflag [#allocation6], %s198_s22  ;;  %s1254_s4 = int_to_ptr.vmem [resolvable:$true] %s212_s4 }
  0x28   : > { %p1263_p9 = pneg %p1240_p5 }
  0x2c   : > { %s1250_s29 = scalar_lea.hbm %s1899_s1, %s1878_s10  ;;  %s913_s30 = scalar_lea.hbm %s1899_s1, 4096 }
  0x2d   : > { %s908_s23 = scalar_lea.hbm %s1250_s29, 2048  ;;  %p914_p12 = scmp.lt.u32.totalorder %s1250_s29, %s1899_s1 }
  0x2e   : > { %p909_p7 = scmp.ne.s32.totalorder %s1250_s29, %s908_s23  ;;  %p915_p13 = scmp.lt.u32.totalorder %s913_s30, %s908_s23 }
  0x2f   : > { %p917_p4 = scmp.lt.u32.totalorder %s908_s23, %s1250_s29 }
  0x30   : > { %p911_p10 = pnand %p1263_p9, %p909_p7  ;;  %p916_p0 = por %p915_p13, %p914_p12 }
  0x32   : > { %p912_p11 = pneg %p911_p10  ;;  %p918_p2 = por %p917_p4, %p916_p0 }
  0x34   : > { %p919_p6 = pnand %p918_p2, %p912_p11 }
  0x36   : > { %922 = shalt.err (!%p919_p6)
}
  0x37   : > { %s923_s22 = scalar_lea.vmem %s1254_s4, 2048  ;;  %s1110_s24 = smov [#allocation5]  }
  0x38   : > { %p924_p7 = scmp.ne.s32.totalorder %s1254_s4, %s923_s22  ;;  %s928_s27 = sshll.u32 %s1110_s24, 4  ;;  %s929_s27 = int_to_ptr.vmem [resolvable:$false] %s928_s27 }
  0x39   : > { %s930_s10 = scalar_lea.vmem %s929_s27, 4096  ;;  %p931_p1 = scmp.lt.s32.totalorder %s1254_s4, %s929_s27 }
  0x3a   : > { %p926_p10 = pnand %p924_p7, %p1263_p9  ;;  %p932_p8 = scmp.lt.s32.totalorder %s930_s10, %s923_s22 }
  0x3c   : > { %p927_p3 = pneg %p926_p10  ;;  %p933_p12 = por %p932_p8, %p931_p1 }
  0x3e   : > { %p934_p13 = pnand %p933_p12, %p927_p3 }
  0x40   : > { %937 = shalt.err (!%p934_p13)
}
  0x41   : > { %s1882_s23 = smov 128   ;;  %s1884_s11 = smov 8  }
  0x42   : > { %822 = dma.hbm_to_vmem [thread:$0]  (!%p1240_p5), %s1250_s29, 2048, %s1254_s4, %s1257_s26, %s1882_s23, %s1882_s23, %s1884_s11  }
  0x43   : > { %p244_p8 = scmp.lt.s32.totalorder %s1108_s20, 3  ;;  %p1901_p1 = scmp.ge.s32.totalorder %s1108_s20, 1 }
  0x44   : > { %s1903_s22 = sshll.u32 %s1189_s25, 11  ;;  %s1904_s0 = sld [smem:[#allocation17_spill]] }
  0x45   : > { %p1293_p2 = pnand %p1901_p1, %p244_p8  ;;  %s1905_s1 = sshll.u32 %s1234_s9, 7 }
  0x46   : > { %s178_s6 = scalar_lea.vmem [#allocation2], %s1905_s1  ;;  %s776_s29 = sshll.u32 %s1234_s9, 5 }
  0x47   : > { %s1902_s30 = scalar_select %p1293_p2, 1, 0 }
  0x48   : > { %s188_s17 = sshll.u32 %s178_s6, 4  ;;  %s175_s4 = scalar_lea.sflag [#allocation3], %s1234_s9  ;;  %s1306_s17 = int_to_ptr.vmem [resolvable:$true] %s188_s17 }
  0x4a   : > { %s1302_s10 = scalar_lea.hbm %s1904_s0, %s1903_s22  ;;  %s943_s22 = scalar_lea.hbm %s1904_s0, 4096 }
  0x4b   : > { %s938_s23 = scalar_lea.hbm %s1302_s10, 2048  ;;  %p944_p0 = scmp.lt.u32.totalorder %s1302_s10, %s1904_s0 }
  0x4c   : > { %p939_p3 = scmp.ne.s32.totalorder %s1302_s10, %s938_s23  ;;  %p945_p4 = scmp.lt.u32.totalorder %s943_s22, %s938_s23 }
  0x4d   : > { %p947_p10 = scmp.lt.u32.totalorder %s938_s23, %s1302_s10 }
  0x4e   : > { %p941_p6 = pnand %p939_p3, %p1263_p9  ;;  %p946_p7 = por %p945_p4, %p944_p0 }
  0x50   : > { %p942_p11 = pneg %p941_p6  ;;  %p948_p12 = por %p947_p10, %p946_p7 }
  0x52   : > { %p949_p13 = pnand %p948_p12, %p942_p11 }
  0x54   : > { %952 = shalt.err (!%p949_p13)
}
  0x55   : > { %s953_s1 = scalar_lea.vmem %s1306_s17, 2048  ;;  %s1113_s6 = smov [#allocation2]  }
  0x56   : > { %p954_p8 = scmp.ne.s32.totalorder %s1306_s17, %s953_s1  ;;  %s958_s11 = sshll.u32 %s1113_s6, 4  ;;  %s959_s11 = int_to_ptr.vmem [resolvable:$false] %s958_s11 }
  0x57   : > { %s960_s5 = scalar_lea.vmem %s959_s11, 4096  ;;  %p961_p6 = scmp.lt.s32.totalorder %s1306_s17, %s959_s11 }
  0x58   : > { %p956_p1 = pnand %p954_p8, %p1263_p9  ;;  %p962_p2 = scmp.lt.s32.totalorder %s960_s5, %s953_s1 }
  0x5a   : > { %p957_p3 = pneg %p956_p1  ;;  %p963_p0 = por %p962_p2, %p961_p6 }
  0x5c   : > { %p964_p4 = pnand %p963_p0, %p957_p3 }
  0x5e   : > { %967 = shalt.err (!%p964_p4)
}
  0x5f   : > { %s1906_s23 = smov 8   ;;  %s1907_s24 = smov 128  }
  0x60   : > { %819 = dma.hbm_to_vmem [thread:$0]  (!%p1240_p5), %s1302_s10, 2048, %s1306_s17, %s175_s4, %s1907_s24, %s1907_s24, %s1906_s23  }
  0x61   : > { %s807_s22 = sshll.u32 %s1189_s25, 9  ;;  %s226_s11 = scalar_lea.vmem [#allocation7], %s776_s29 }
  0x62   : > { %s1340_s1 = scalar_lea.hbm %s1873_s2, %s807_s22  ;;  %s236_s5 = sshll.u32 %s226_s11, 4  ;;  %s1344_s5 = int_to_ptr.vmem [resolvable:$true] %s236_s5 }
  0x63   : > { %s968_s0 = scalar_lea.hbm %s1340_s1, 512  ;;  %s973_s10 = scalar_lea.hbm %s1873_s2, 1024 }
  0x64   : > { %p969_p2 = scmp.ne.s32.totalorder %s1340_s1, %s968_s0  ;;  %p974_p10 = scmp.lt.u32.totalorder %s1340_s1, %s1873_s2 }
  0x65   : > { %p975_p12 = scmp.lt.u32.totalorder %s973_s10, %s968_s0  ;;  %p977_p8 = scmp.lt.u32.totalorder %s968_s0, %s1340_s1 }
  0x66   : > { %p971_p11 = pnand %p969_p2, %p1263_p9 }
  0x67   : > { %p976_p13 = por %p975_p12, %p974_p10 }
  0x68   : > { %p972_p7 = pneg %p971_p11 }
  0x69   : > { %p978_p1 = por %p977_p8, %p976_p13 }
  0x6b   : > { %p979_p3 = pnand %p978_p1, %p972_p7 }
  0x6d   : > { %982 = shalt.err (!%p979_p3)
}
  0x6e   : > { %s983_s9 = scalar_lea.vmem %s1344_s5, 512  ;;  %s1114_s29 = smov [#allocation7]  }
  0x6f   : > { %p984_p6 = scmp.ne.s32.totalorder %s1344_s5, %s983_s9  ;;  %s988_s27 = sshll.u32 %s1114_s29, 4  ;;  %s989_s27 = int_to_ptr.vmem [resolvable:$false] %s988_s27 }
  0x70   : > { %s990_s6 = scalar_lea.vmem %s989_s27, 1024  ;;  %p991_p2 = scmp.lt.s32.totalorder %s1344_s5, %s989_s27 }
  0x71   : > { %p986_p0 = pnand %p984_p6, %p1263_p9  ;;  %p992_p11 = scmp.lt.s32.totalorder %s990_s6, %s983_s9 }
  0x73   : > { %p987_p4 = pneg %p986_p0  ;;  %p993_p10 = por %p992_p11, %p991_p2 }
  0x75   : > { %p994_p12 = pnand %p993_p10, %p987_p4 }
  0x77   : > { %997 = shalt.err (!%p994_p12)
}
  0x78   : > { %825 = dma.hbm_to_vmem [thread:$0]  (!%p1240_p5), %s1340_s1, 512, %s1344_s5, %s1257_s26, %s1907_s24, %s1907_s24, %s1906_s23  }
  0x79   : > { %p1908_p9 = scmp.ne.s32.totalorder %s1902_s30, 0 }
  0x7a   : > { %s250_s0 = sand.u32 (!%p1908_p9), 1, %s1092_s16   ;;  %p1909_p7 = scmp.ne.s32.totalorder (!%p1908_p9), %s1893_s28, 0 }
  0x7b   : > { %248 = sbr.rel (%p1908_p9) target bundleno = 244 (0xf4), region = 32  ;;  %s780_s19 = sshll.u32 (!%p1908_p9), %s250_s0, 7 }
  0x7c   : > { %s251_s11 = scalar_lea.sflag (!%p1908_p9), [#allocation3], %s250_s0  ;;  %s1374_s17 = scalar_lea.vmem (!%p1908_p9), [#allocation2], %s780_s19 }
  0x82   : > { %1063 = dma.done.wait (%p1909_p7), %s251_s11, 2048  }
  0x83   : > { %1065 = vsyncadd (%p1909_p7), %s251_s11, 4294965248  ;;  %s259_s15 = sand.u32 1, %s1182_s21   ;;  %s1381_s26 = scalar_lea.vmem [#allocation5], %s780_s19 }
  0x84   : > { %s260_s25 = scalar_lea.sflag [#allocation6], %s259_s15 }
  0x85   : > { %1067 = dma.done.wait (%p1909_p7), %s260_s25, 2560  }
  0x86   : > { %1069 = vsyncadd (%p1909_p7), %s260_s25, 4294964736  ;;  %s782_s30 = sshll.u32 %s250_s0, 5  ;;  %s302_s23 = sand.u32 1, %s1080_s13   ;;  %v1115_v0 = vmov 0.0  }
  0x87   : > { %s783_s24 = sshll.u32 %s302_s23, 3  ;;  %s1393_s21 = scalar_lea.vmem [#allocation7], %s782_s30 }
  0x88   : > { %s1390_s1 = scalar_lea.vmem [#allocation8], %s783_s24  ;;  %p784_p5 = scmp.ge.s32.totalorder %s1100_s18, 2 }
  0x89   : > { %324 = vst [vmem:[%s1390_s1] sm:$0xff] %v1115_v0  ;;  %v329_v1 = vld [vmem:[%s1374_s17] sm:$0xff] (!%p784_p5)  ;;  %v330_v2 = vld [vmem:[%s1374_s17 + $0x8] sm:$0xff] (!%p784_p5)  ;;  %v331_v3 = vld [vmem:[%s1374_s17 + $0x10] sm:$0xff] (!%p784_p5) }
  0x8a   : > { %328 = sbr.rel (%p784_p5) target bundleno = 219 (0xdb), region = 52  ;;  %v345_v4 = vld [vmem:[%s1381_s26] sm:$0xff] (!%p784_p5)  ;;  %v332_v5 = vld [vmem:[%s1374_s17 + $0x18] sm:$0xff] (!%p784_p5)  ;;  %v346_v7 = vld [vmem:[%s1381_s26 + $0x8] sm:$0xff] (!%p784_p5) }
  0x8b   : > { %v333_v6 = vld [vmem:[%s1374_s17 + $0x20] sm:$0xff] (!%p784_p5)  ;;  %v334_v8 = vld [vmem:[%s1374_s17 + $0x28] sm:$0xff] (!%p784_p5)  ;;  %v335_v9 = vld [vmem:[%s1374_s17 + $0x30] sm:$0xff] (!%p784_p5)  ;;  %v1412_v17 = vsub.f32 (!%p784_p5), %v329_v1, %v345_v4  ;;  %v1420_v24 = vsub.f32 (!%p784_p5), %v330_v2, %v346_v7  ;;  %v1116_v7 = vmov (!%p784_p5), 0  }
  0x8c   : > { %v336_v10 = vld [vmem:[%s1374_s17 + $0x38] sm:$0xff] (!%p784_p5)  ;;  %v347_v11 = vld [vmem:[%s1381_s26 + $0x10] sm:$0xff] (!%p784_p5)  ;;  %v337_v12 = vld [vmem:[%s1374_s17 + $0x40] sm:$0xff] (!%p784_p5) }
  0x8d   : > { %v338_v13 = vld [vmem:[%s1374_s17 + $0x48] sm:$0xff] (!%p784_p5)  ;;  %v339_v14 = vld [vmem:[%s1374_s17 + $0x50] sm:$0xff] (!%p784_p5)  ;;  %v348_v15 = vld [vmem:[%s1381_s26 + $0x18] sm:$0xff] (!%p784_p5)  ;;  %v1426_v29 = vsub.f32 (!%p784_p5), %v331_v3, %v347_v11  ;;  %v377_v41 = vand.u32 (!%p784_p5), 2147483647, %v1412_v17  ;;  %v409_v4 = vmul.f32 (!%p784_p5), 0.5, %v1412_v17 }
  0x8e   : > { %v349_v16 = vld [vmem:[%s1381_s26 + $0x20] sm:$0xff] (!%p784_p5)  ;;  %v340_v18 = vld [vmem:[%s1374_s17 + $0x58] sm:$0xff] (!%p784_p5)  ;;  %v342_v20 = vld [vmem:[%s1374_s17 + $0x68] sm:$0xff] (!%p784_p5)  ;;  %v1431_v33 = vsub.f32 (!%p784_p5), %v332_v5, %v348_v15  ;;  %v378_v45 = vand.u32 (!%p784_p5), 2147483647, %v1420_v24  ;;  %v410_v5 = vmul.f32 (!%p784_p5), 0.5, %v1420_v24 }
  0x8f   : > { %v341_v19 = vld [vmem:[%s1374_s17 + $0x60] sm:$0xff] (!%p784_p5)  ;;  %v350_v21 = vld [vmem:[%s1381_s26 + $0x28] sm:$0xff] (!%p784_p5)  ;;  %v351_v22 = vld [vmem:[%s1381_s26 + $0x30] sm:$0xff] (!%p784_p5)  ;;  %v1433_v34 = vsub.f32 (!%p784_p5), %v333_v6, %v349_v16  ;;  %v379_v49 = vand.u32 (!%p784_p5), 2147483647, %v1426_v29  ;;  %v411_v6 = vmul.f32 (!%p784_p5), 0.5, %v1426_v29 }
  0x90   : > { %v352_v23 = vld [vmem:[%s1381_s26 + $0x38] sm:$0xff] (!%p784_p5)  ;;  %v343_v25 = vld [vmem:[%s1374_s17 + $0x70] sm:$0xff] (!%p784_p5)  ;;  %v353_v26 = vld [vmem:[%s1381_s26 + $0x40] sm:$0xff] (!%p784_p5)  ;;  %v1438_v38 = vsub.f32 (!%p784_p5), %v334_v8, %v350_v21  ;;  %v1440_v39 = vsub.f32 (!%p784_p5), %v335_v9, %v351_v22  ;;  %v380_v53 = vand.u32 (!%p784_p5), 2147483647, %v1431_v33  ;;  %v412_v9 = vmul.f32 (!%p784_p5), 0.5, %v1431_v33 }
  0x91   : > { %v354_v27 = vld [vmem:[%s1381_s26 + $0x48] sm:$0xff]  ;;  %v355_v28 = vld [vmem:[%s1381_s26 + $0x50] sm:$0xff]  ;;  %v356_v30 = vld [vmem:[%s1381_s26 + $0x58] sm:$0xff]  ;;  %v1442_v40 = vsub.f32 %v336_v10, %v352_v23  ;;  %v1445_v42 = vsub.f32 %v337_v12, %v353_v26  ;;  %v381_v54 = vand.u32 2147483647, %v1433_v34  ;;  %v413_v10 = vmul.f32 0.5, %v1433_v34 }
  0x92   : > { %v357_v31 = vld [vmem:[%s1381_s26 + $0x60] sm:$0xff]  ;;  %v358_v32 = vld [vmem:[%s1381_s26 + $0x68] sm:$0xff]  ;;  %v344_v35 = vld [vmem:[%s1374_s17 + $0x78] sm:$0xff]  ;;  %v1447_v43 = vsub.f32 %v338_v13, %v354_v27  ;;  %v1449_v44 = vsub.f32 %v339_v14, %v355_v28  ;;  %v1452_v46 = vsub.f32 %v340_v18, %v356_v30  ;;  %v382_v55 = vand.u32 2147483647, %v1438_v38 }
  0x93   : > { %v359_v36 = vld [vmem:[%s1381_s26 + $0x70] sm:$0xff]  ;;  %v360_v37 = vld [vmem:[%s1381_s26 + $0x78] sm:$0xff]  ;;  %v1454_v47 = vsub.f32 %v341_v19, %v357_v31  ;;  %v1456_v48 = vsub.f32 %v342_v20, %v358_v32  ;;  %v473_v50 = vld [vmem:[%s1393_s21] sm:$0xff]  ;;  %v383_v56 = vand.u32 2147483647, %v1440_v39  ;;  %v414_v11 = vmul.f32 0.5, %v1438_v38 }
  0x94   : > { %v1460_v51 = vsub.f32 %v343_v25, %v359_v36  ;;  %v1462_v52 = vsub.f32 %v344_v35, %v360_v37  ;;  %v474_v57 = vld [vmem:[%s1393_s21 + $0x8] sm:$0xff]  ;;  %v384_v58 = vand.u32 2147483647, %v1442_v40  ;;  %v385_v59 = vand.u32 2147483647, %v1445_v42  ;;  %v1473_v61 = vld [vmem:[%s1393_s21 + $0x10] sm:$0xff] }
  0x95   : > { %v386_v60 = vand.u32 2147483647, %v1447_v43  ;;  %vm477_vm0 = vnez %v473_v50  ;;  %v1886_v62 = vand.u32 2147483647, %v1449_v44  ;;  %vm478_vm1 = vnez %v474_v57 }
  0x96   : > { %v482_v8 = vsel %vm477_vm0, 16843009, %v1116_v7  ;;  %v415_v12 = vmul.f32 0.5, %v1440_v39  ;;  %v416_v13 = vmul.f32 0.5, %v1442_v40  ;;  %v417_v14 = vmul.f32 0.5, %v1445_v42 }
  0x97   : > { %v418_v15 = vmul.f32 0.5, %v1447_v43  ;;  %v419_v16 = vmul.f32 0.5, %v1449_v44  ;;  %vm479_vm2 = vnez %v1473_v61  ;;  %v420_v18 = vmul.f32 0.5, %v1452_v46 }
  0x98   : > { %v421_v19 = vmul.f32 0.5, %v1454_v47  ;;  %v486_v20 = vunpack.c.0.s8 %v482_v8  ;;  %v487_v21 = vunpack.c.1.s8 %v482_v8  ;;  %v1497_v22 = vmul.f32 0.5, %v1456_v48 }
  0x99   : > { %v1500_v23 = vmul.f32 0.5, %v1460_v51  ;;  %v1503_v25 = vmul.f32 0.5, %v1462_v52  ;;  %v1506_v26 = vmul.f32 %v409_v4, %v1412_v17  ;;  %vm1510_vm3 = vcmp.lt.f32.partialorder %v377_v41, 1.0 }
  0x9a   : > { %vm1516_vm4 = vcmp.lt.f32.partialorder %v378_v45, 1.0  ;;  %vm1522_vm5 = vcmp.lt.f32.partialorder %v379_v49, 1.0  ;;  %v1527_v31 = vmul.f32 %v410_v5, %v1420_v24  ;;  %v1530_v32 = vmul.f32 %v411_v6, %v1426_v29  ;;  %v476_v24 = vld [vmem:[%s1393_s21 + $0x18] sm:$0xff] }
  0x9b   : > { %v1533_v35 = vmul.f32 %v412_v9, %v1431_v33  ;;  %v488_v36 = vunpack.c.2.s8 %v482_v8  ;;  %vm1537_vm6 = vcmp.lt.f32.partialorder %v380_v53, 1.0  ;;  %v1542_v50 = vmul.f32 %v413_v10, %v1433_v34 }
  0x9c   : > { %v1545_v4 = vmul.f32 %v414_v11, %v1438_v38  ;;  %v1548_v5 = vmul.f32 %v415_v12, %v1440_v39  ;;  %v483_v6 = vsel %vm478_vm1, 16843009, %v1116_v7  ;;  %vm1554_vm7 = vcmp.lt.f32.partialorder %v381_v54, 1.0 }
  0x9d   : > { %v1559_v3 = vmul.f32 %v416_v13, %v1442_v40  ;;  %v489_v10 = vunpack.c.3.s8 %v482_v8  ;;  %v502_v2 = vpack.c.b16 %v486_v20, %v486_v20  ;;  %v504_v11 = vpack.c.b16 %v487_v21, %v487_v21 }
  0x9e   : > { %v1562_v1 = vmul.f32 %v417_v14, %v1445_v42  ;;  %v1565_v12 = vmul.f32 %v418_v15, %v1447_v43  ;;  %v1568_v57 = vmul.f32 %v419_v16, %v1449_v44  ;;  %v1571_v0 = vmul.f32 %v420_v18, %v1452_v46 }
  0x9f   : > { %vm1575_vm8 = vcmp.lt.f32.partialorder %v382_v55, 1.0  ;;  %v1580_v8 = vmul.f32 %v421_v19, %v1454_v47  ;;  %v1584_v14 = vadd.f32 -0.5, %v377_v41  ;;  %v490_v15 = vunpack.c.0.s8 %v483_v6 }
  0xa0   : > { %v506_v20 = vpack.c.b16 %v488_v36, %v488_v36  ;;  %v1588_v16 = vadd.f32 -0.5, %v378_v45  ;;  %v1592_v18 = vadd.f32 -0.5, %v379_v49  ;;  %v1596_v21 = vadd.f32 -0.5, %v380_v53 }
  0xa1   : > { %v1600_v19 = vadd.f32 -0.5, %v381_v54  ;;  %vm1604_vm9 = vcmp.lt.f32.partialorder %v383_v56, 1.0  ;;  %v491_v41 = vunpack.c.1.s8 %v483_v6  ;;  %v503_v45 = vpack.c.b8 %v502_v2, %v502_v2 }
  0xa2   : > { %v505_v29 = vpack.c.b8 %v504_v11, %v504_v11  ;;  %v508_v49 = vpack.c.b16 %v489_v10, %v489_v10  ;;  %v1611_v33 = vadd.f32 -0.5, %v382_v55  ;;  %v1615_v34 = vadd.f32 -0.5, %v383_v56 }
  0xa3   : > { %v1619_v53 = vadd.f32 -0.5, %v384_v58  ;;  %v1623_v54 = vadd.f32 -0.5, %v385_v59  ;;  %v484_v2 = vsel %vm479_vm2, 16843009, %v1116_v7  ;;  %v492_v36 = vunpack.c.2.s8 %v483_v6 }
  0xa4   : > { %v507_v38 = vpack.c.b8 %v506_v20, %v506_v20  ;;  %v510_v55 = vpack.c.b16 %v490_v15, %v490_v15  ;;  %v1630_v39 = vadd.f32 -0.5, %v386_v60  ;;  %v1634_v56 = vadd.f32 -0.5, %v1886_v62 }
  0xa5   : > { %vm480_vm10 = vnez %v476_v24  ;;  %v493_v10 = vunpack.c.3.s8 %v483_v6  ;;  %v509_v11 = vpack.c.b8 %v508_v49, %v508_v49  ;;  %v512_v63 = vpack.c.b16 %v491_v41, %v491_v41 }
  0xa6   : > { %vm534_vm11 = vnez %v503_v45  ;;  %vm535_vm12 = vnez %v505_v29  ;;  %v457_v61 = vsel %vm1510_vm3, %v1506_v26, %v1584_v14  ;;  %v458_v15 = vsel %vm1516_vm4, %v1527_v31, %v1588_v16 }
  0xa7   : > { %v459_v20 = vsel %vm1522_vm5, %v1530_v32, %v1592_v18  ;;  %v494_v6 = vunpack.c.0.s8 %v484_v2  ;;  %v511_v41 = vpack.c.b8 %v510_v55, %v510_v55  ;;  %v514_v45 = vpack.c.b16 %v492_v36, %v492_v36 }
  0xa8   : > { %vm536_vm13 = vnez %v507_v38  ;;  %v1657_v27 = vsel %vm480_vm10, 16843009, %v1116_v7  ;;  %v550_v28 = vsel %vm534_vm11, 16843009, %v1116_v7  ;;  %v551_v30 = vsel %vm535_vm12, 16843009, %v1116_v7 }
  0xa9   : > { %v495_v31 = vunpack.c.1.s8 %v484_v2  ;;  %v513_v32 = vpack.c.b8 %v512_v63, %v512_v63  ;;  %v516_v14 = vpack.c.b16 %v493_v10, %v493_v10  ;;  %vm537_vm14 = vnez %v509_v11 }
  0xaa   : > { %v496_v18 = vunpack.c.2.s8 %v484_v2  ;;  %v518_v29 = vpack.c.b16 %v494_v6, %v494_v6  ;;  %v552_v49 = vsel %vm536_vm13, 16843009, %v1116_v7  ;;  %v515_v36 = vpack.c.b8 %v514_v45, %v514_v45 }
  0xab   : > { %vm538_vm15 = vnez %v511_v41  ;;  %v566_v38 = vunpack.c.0.s8 %v550_v28  ;;  %v567_v55 = vunpack.c.0.s8 %v551_v30  ;;  %v463_v63 = vsel %vm1604_vm9, %v1548_v5, %v1615_v34 }
  0xac   : > { %v497_v10 = vunpack.c.3.s8 %v484_v2  ;;  %v498_v11 = vunpack.c.0.s8 %v1657_v27  ;;  %v553_v26 = vsel %vm537_vm14, 16843009, %v1116_v7  ;;  %v517_v24 = vpack.c.b8 %v516_v14, %v516_v14 }
  0xad   : > { %v520_v16 = vpack.c.b16 %v495_v31, %v495_v31  ;;  %vm539_vm0 = vnez %v513_v32  ;;  %v568_v6 = vunpack.c.0.s8 %v552_v49  ;;  %v499_v62 = vunpack.c.1.s8 %v1657_v27 }
  0xae   : > { %v519_v45 = vpack.c.b8 %v518_v29, %v518_v29  ;;  %v522_v41 = vpack.c.b16 %v496_v18, %v496_v18  ;;  %v554_v28 = vsel %vm538_vm15, 16843009, %v1116_v7  ;;  %vm1676_vm1 = vcmp.lt.f32.partialorder %v384_v58, 1.0 }
  0xaf   : > { %vm540_vm2 = vnez %v515_v36  ;;  %v569_v2 = vunpack.c.0.s8 %v553_v26  ;;  %vm582_vm3 = vcmp.ne.s32.totalorder %v566_v38, 0  ;;  %vm583_vm4 = vcmp.ne.s32.totalorder %v567_v55, 0 }
  0xb0   : > { %v500_v31 = vunpack.c.2.s8 %v1657_v27  ;;  %v501_v32 = vunpack.c.3.s8 %v1657_v27  ;;  %v524_v14 = vpack.c.b16 %v497_v10, %v497_v10  ;;  %v555_v29 = vsel %vm539_vm0, 16843009, %v1116_v7 }
  0xb1   : > { %vm1685_vm5 = vcmp.lt.f32.partialorder %v385_v59, 1.0  ;;  %v521_v40 = vpack.c.b8 %v520_v16, %v520_v16  ;;  %vm541_vm10 = vnez %v517_v24  ;;  %v570_v58 = vunpack.c.0.s8 %v554_v28 }
  0xb2   : > { %vm584_vm11 = vcmp.ne.s32.totalorder %v568_v6, 0  ;;  %v526_v26 = vpack.c.b16 %v498_v11, %v498_v11  ;;  %v556_v49 = vsel %vm540_vm2, 16843009, %v1116_v7  ;;  %v598_v36 = vsel %vm582_vm3, %v457_v61, 0.0 }
  0xb3   : > { %v599_v38 = vsel %vm583_vm4, %v458_v15, 0.0  ;;  %vm1692_vm12 = vcmp.lt.f32.partialorder %v386_v60, 1.0  ;;  %v523_v42 = vpack.c.b8 %v522_v41, %v522_v41  ;;  %vm542_vm13 = vnez %v519_v45 }
  0xb4   : > { %v571_v59 = vunpack.c.0.s8 %v555_v29  ;;  %vm585_vm14 = vcmp.ne.s32.totalorder %v569_v2, 0  ;;  %v525_v55 = vpack.c.b8 %v524_v14, %v524_v14  ;;  %v528_v16 = vpack.c.b16 %v499_v62, %v499_v62 }
  0xb5   : > { %v557_v24 = vsel %vm541_vm10, 16843009, %v1116_v7  ;;  %v600_v10 = vsel %vm584_vm11, %v459_v20, 0.0  ;;  %v1930_v11 = vand.u32 2147483647, %v1449_v44  ;;  %vm543_vm0 = vnez %v521_v40 }
  0xb6   : > { %v572_v43 = vunpack.c.0.s8 %v556_v49  ;;  %vm586_vm2 = vcmp.ne.s32.totalorder %v570_v58, 0  ;;  %v614_v60 = vadd.f32 %v599_v38, %v598_v36  ;;  %v527_v15 = vpack.c.b8 %v526_v26, %v526_v26 }
  0xb7   : > { %vm1699_vm15 = vcmp.lt.f32.partialorder %v1930_v11, 1.0  ;;  %v530_v6 = vpack.c.b16 %v500_v31, %v500_v31  ;;  %v558_v45 = vsel %vm542_vm13, 16843009, %v1116_v7  ;;  %v1933_v62 = vsel %vm1537_vm6, %v1533_v35, %v1596_v21 }
  0xb8   : > { %v601_v20 = vsel %vm585_vm14, %v1933_v62, 0.0  ;;  %vm1709_vm3 = vnez %v523_v42  ;;  %v573_v41 = vunpack.c.0.s8 %v557_v24  ;;  %vm587_vm4 = vcmp.ne.s32.totalorder %v571_v59, 0 }
  0xb9   : > { %v615_v28 = vadd.f32 %v614_v60, %v600_v10  ;;  %v1936_v2 = vand.u32 2147483647, %v1452_v46  ;;  %v529_v31 = vpack.c.b8 %v528_v16, %v528_v16  ;;  %v532_v29 = vpack.c.b16 %v501_v32, %v501_v32 }
  0xba   : > { %v559_v37 = vsel %vm543_vm0, 16843009, %v1116_v7  ;;  %v1939_v35 = vsel %vm1554_vm7, %v1542_v50, %v1600_v19  ;;  %vm1725_vm6 = vnez %v525_v55  ;;  %v574_v58 = vunpack.c.0.s8 %v558_v45 }
  0xbb   : > { %vm1715_vm10 = vcmp.lt.f32.partialorder %v1936_v2, 1.0  ;;  %v602_v21 = vsel %vm586_vm2, %v1939_v35, 0.0  ;;  %vm588_vm11 = vcmp.ne.s32.totalorder %v572_v43, 0  ;;  %v616_v26 = vadd.f32 %v615_v28, %v601_v20 }
  0xbc   : > { %v1942_v49 = vand.u32 2147483647, %v1454_v47  ;;  %v464_v9 = vsel %vm1676_vm1, %v1559_v3, %v1619_v53  ;;  %v531_v50 = vpack.c.b8 %v530_v6, %v530_v6  ;;  %v560_v19 = vsel %vm1709_vm3, 16843009, %v1116_v7 }
  0xbd   : > { %v1945_v32 = vsel %vm1575_vm8, %v1545_v4, %v1611_v33  ;;  %vm546_vm7 = vnez %v527_v15  ;;  %v575_v42 = vunpack.c.0.s8 %v559_v37  ;;  %vm589_vm14 = vcmp.ne.s32.totalorder %v573_v41, 0 }
  0xbe   : > { %vm1731_vm13 = vcmp.lt.f32.partialorder %v1942_v49, 1.0  ;;  %v603_v38 = vsel %vm587_vm4, %v1945_v32, 0.0  ;;  %v617_v59 = vadd.f32 %v616_v26, %v602_v21  ;;  %v1946_v55 = vand.u32 2147483647, %v1456_v48 }
  0xbf   : > { %v465_v3 = vsel %vm1685_vm5, %v1562_v1, %v1623_v54  ;;  %v533_v13 = vpack.c.b8 %v532_v29, %v532_v29  ;;  %v561_v4 = vsel %vm1725_vm6, 16843009, %v1116_v7  ;;  %v604_v33 = vsel %vm588_vm11, %v463_v63, 0.0 }
  0xc0   : > { %vm1749_vm0 = vcmp.lt.f32.partialorder %v1946_v55, 1.0  ;;  %vm547_vm8 = vnez %v529_v31  ;;  %v576_v53 = vunpack.c.0.s8 %v560_v19  ;;  %vm590_vm1 = vcmp.ne.s32.totalorder %v574_v58, 0  ;;  %v481_v19 = vld [vmem:[%s1390_s1] sm:$0xff] }
  0xc1   : > { %v618_v16 = vadd.f32 %v617_v59, %v603_v38  ;;  %v1949_v24 = vmov %v1936_v2  ;;  %v466_v1 = vsel %vm1692_vm12, %v1565_v12, %v1630_v39  ;;  %v562_v54 = vsel %vm546_vm7, 16843009, %v1116_v7 }
  0xc2   : > { %v796_v10 = vadd.f32 -0.5, %v1949_v24  ;;  %v605_v18 = vsel %vm589_vm14, %v464_v9, 0.0  ;;  %vm548_vm5 = vnez %v531_v50  ;;  %v577_v17 = vunpack.c.0.s8 %v561_v4 }
  0xc3   : > { %vm591_vm2 = vcmp.ne.s32.totalorder %v575_v42, 0  ;;  %v619_v5 = vadd.f32 %v618_v16, %v604_v33  ;;  %v1950_v34 = vmov %v1942_v49  ;;  %v467_v46 = vsel %vm1699_vm15, %v1568_v57, %v1634_v56 }
  0xc4   : > { %v797_v63 = vadd.f32 -0.5, %v1950_v34  ;;  %v563_v11 = vsel %vm547_vm8, 16843009, %v1116_v7  ;;  %v606_v43 = vsel %vm590_vm1, %v465_v3, 0.0  ;;  %vm549_vm9 = vnez %v533_v13 }
  0xc5   : > { %v578_v12 = vunpack.c.0.s8 %v562_v54  ;;  %vm592_vm12 = vcmp.ne.s32.totalorder %v576_v53, 0  ;;  %v620_v39 = vadd.f32 %v619_v5, %v605_v18  ;;  %v438_v27 = vmul.f32 %v1497_v22, %v1456_v48 }
  0xc6   : > { %v1951_v60 = vmov %v1946_v55  ;;  %v564_v47 = vsel %vm548_vm5, 16843009, %v1116_v7  ;;  %v607_v6 = vsel %vm591_vm2, %v466_v1, 0.0  ;;  %v468_v57 = vsel %vm1715_vm10, %v1571_v0, %v796_v10 }
  0xc7   : > { %v798_v15 = vadd.f32 -0.5, %v1951_v60  ;;  %v579_v56 = vunpack.c.0.s8 %v563_v11  ;;  %vm593_vm15 = vcmp.ne.s32.totalorder %v577_v17, 0  ;;  %v621_v61 = vadd.f32 %v620_v39, %v606_v43 }
  0xc8   : > { %v439_v45 = vmul.f32 %v1500_v23, %v1460_v51  ;;  %v1952_v62 = vand.u32 2147483647, %v1460_v51  ;;  %v565_v22 = vsel %vm549_vm9, 16843009, %v1116_v7  ;;  %v608_v48 = vsel %vm592_vm12, %v467_v46, 0.0 }
  0xc9   : > { %v469_v44 = vsel %vm1731_vm13, %v1580_v8, %v797_v63  ;;  %v580_v41 = vunpack.c.0.s8 %v564_v47  ;;  %vm594_vm3 = vcmp.ne.s32.totalorder %v578_v12, 0  ;;  %v622_v28 = vadd.f32 %v621_v61, %v607_v6 }
  0xca   : > { %v799_v20 = vadd.f32 -0.5, %v1952_v62  ;;  %v1953_v0 = vmov %v1952_v62  ;;  %v440_v23 = vmul.f32 %v1503_v25, %v1462_v52  ;;  %v1956_v14 = vand.u32 2147483647, %v1462_v52 }
  0xcb   : > { %vm1797_vm4 = vcmp.lt.f32.partialorder %v1953_v0, 1.0  ;;  %v609_v31 = vsel %vm593_vm15, %v468_v57, 0.0  ;;  %v470_v29 = vsel %vm1749_vm0, %v438_v27, %v798_v15  ;;  %v581_v8 = vunpack.c.0.s8 %v565_v22 }
  0xcc   : > { %v800_v7 = vadd.f32 -0.5, %v1956_v14  ;;  %vm595_vm10 = vcmp.ne.s32.totalorder %v579_v56, 0  ;;  %v623_v37 = vadd.f32 %v622_v28, %v608_v48  ;;  %v1957_v51 = vmov %v1956_v14 }
  0xcd   : > { %vm408_vm6 = vcmp.lt.f32.partialorder %v1957_v51, 1.0  ;;  %v610_v35 = vsel %vm594_vm3, %v469_v44, 0.0  ;;  %v471_v21 = vsel %vm1797_vm4, %v439_v45, %v799_v20  ;;  %vm596_vm11 = vcmp.ne.s32.totalorder %v580_v41, 0 }
  0xce   : > { %v624_v25 = vadd.f32 %v623_v37, %v609_v31  ;;  %v611_v40 = vsel %vm595_vm10, %v470_v29, 0.0  ;;  %v472_v58 = vsel %vm408_vm6, %v440_v23, %v800_v7  ;;  %vm597_vm13 = vcmp.ne.s32.totalorder %v581_v8, 0 }
  0xcf   : > { %v612_v49 = vsel %vm596_vm11, %v471_v21, 0.0  ;;  %v613_v9 = vsel %vm597_vm13, %v472_v58, 0.0 }
  0xd0   : > { %v625_v26 = vadd.f32 %v624_v25, %v610_v35 }
  0xd2   : > { %v626_v36 = vadd.f32 %v625_v26, %v611_v40 }
  0xd4   : > { %v627_v50 = vadd.f32 %v626_v36, %v612_v49 }
  0xd6   : > { %v628_v32 = vadd.f32 %v627_v50, %v613_v9 }
  0xd8   : > { %v629_v38 = vadd.f32 %v628_v32, %v481_v19 }
  0xda   : > { %630 = vst [vmem:[%s1390_s1] sm:$0xff] %v629_v38 }
  0xdb PF: > { %s802_s28 = sshll.u32 %s1100_s18, 7  ;;  %s645_s22 = sshll.u32 %s1390_s1, 4  ;;  %s646_s22 = int_to_ptr.vmem [resolvable:$true] %s645_s22 }
  0xdc   : > { %s1817_s4 = scalar_lea.hbm %s1874_s3, %s802_s28  ;;  %s632_s9 = scalar_lea.sflag [#allocation4], %s302_s23 }
  0xdd   : > { %s998_s29 = scalar_lea.vmem %s646_s22, 128  ;;  %p1958_p8 = scmp.ne.s32.totalorder %s1896_s7, 0 }
  0xde   : > { %p999_p13 = scmp.ne.s32.totalorder %s646_s22, %s998_s29  ;;  %s1117_s27 = smov [#allocation8]  }
  0xdf   : > { %s1002_s6 = sshll.u32 %s1117_s27, 4  ;;  %s1003_s6 = int_to_ptr.vmem [resolvable:$false] %s1002_s6 }
  0xe0   : > { %p1000_p1 = pnand %p999_p13, %p1958_p8  ;;  %s1004_s0 = scalar_lea.vmem %s1003_s6, 256 }
  0xe1   : > { %p1005_p6 = scmp.lt.s32.totalorder %s646_s22, %s1003_s6  ;;  %p1006_p0 = scmp.lt.s32.totalorder %s1004_s0, %s998_s29 }
  0xe2   : > { %p1001_p3 = pneg %p1000_p1 }
  0xe3   : > { %p1007_p4 = por %p1006_p0, %p1005_p6 }
  0xe5   : > { %p1008_p2 = pnand %p1007_p4, %p1001_p3 }
  0xe7   : > { %1011 = shalt.err (!%p1008_p2)
}
  0xe8   : > { %s1012_s18 = scalar_lea.hbm %s1817_s4, 128  ;;  %s1016_s17 = scalar_lea.hbm %s1874_s3, 256 }
  0xe9   : > { %p1013_p11 = scmp.ne.s32.totalorder %s1817_s4, %s1012_s18  ;;  %p1017_p9 = scmp.lt.u32.totalorder %s1817_s4, %s1874_s3 }
  0xea   : > { %p1018_p7 = scmp.lt.u32.totalorder %s1016_s17, %s1012_s18  ;;  %p1020_p13 = scmp.lt.u32.totalorder %s1012_s18, %s1817_s4 }
  0xeb   : > { %p1014_p10 = pnand %p1013_p11, %p1958_p8 }
  0xec   : > { %p1019_p5 = por %p1018_p7, %p1017_p9 }
  0xed   : > { %p1015_p12 = pneg %p1014_p10 }
  0xee   : > { %p1021_p1 = por %p1020_p13, %p1019_p5 }
  0xf0   : > { %p1022_p3 = pnand %p1021_p1, %p1015_p12 }
  0xf2   : > { %1025 = shalt.err (!%p1022_p3)
}
  0xf3   : > { %814 = dma.vmem_to_hbm [thread:$0]  (%p1958_p8), %s646_s22, 128, %s1817_s4, %s632_s9  }
  0xf4 PF: > { %s657_s26 = sand.u32 1, %s1076_s12   ;;  %p1959_p6 = scmp.ne.s32.totalorder %s1897_s8, 0 }
  0xf5   : > { %p1960_p0 = scmp.ge.s32.totalorder %s1108_s20, 2  ;;  %s658_s30 = scalar_lea.sflag [#allocation4], %s657_s26 }
  0xf7   : > { %p827_p4 = pnand %p1960_p0, %p1959_p6 }
  0xf9   : > { %1071 = dma.done.wait (!%p827_p4), %s658_s30, 128  }
  0xfa   : > { %1073 = vsyncadd (!%p827_p4), %s658_s30, 4294967168  ;;  %s22_s20 = sadd.s32 1, %s1108_s20   ;;  %s1961_s23 = sld [smem:[#allocation15_spill]] }
  0xfb   : > { %p19_p2 = scmp.ge.s32.totalorder %s22_s20, 4   ;;  %s1962_s7 = sld [smem:[#allocation12_spill]] }
  0xfc   : > { %s1963_s17 = sld [smem:[#allocation16_spill]]  ;;  %s1964_s18 = sld [smem:[#allocation13_spill]] }
  0xfd   : > { %s1965_s19 = sld [smem:[#allocation14_spill]]  ;;  %s1966_s12 = smov %s1080_s13 }
  0xfe   : > { %s1967_s13 = smov %s1084_s14  ;;  %s1969_s15 = smov %s1092_s16 }
  0xff   :  { %21 = sbr.rel (!%p19_p2) target bundleno = 13 (0xd), region = 109 }
 0x100   : > { %s1968_s14 = smov %s1961_s23 }
 0x101   : > { %s1970_s16 = smov %s1962_s7 }
 0x106   :  { %663 = vsyncpa [#allocation3], 1 }
 0x107   :  { %665 = vsyncpa [#allocation3 + $0x1], 1 }
 0x108   :  { %666 = vsyncpa [#allocation6], 1 }
 0x109   :  { %668 = vsyncpa [#allocation6 + $0x1], 1 }
 0x10a   :  { %669 = vsyncpa [#allocation4], 1 }
 0x10b   :  { %671 = vsyncpa [#allocation4 + $0x1], 1 }

</bundles_post_ra>
